<compile_context>
chip_gen: v6e
topology: v6e:2x2x1
jax: 0.10.0
libtpu: 0.0.40
codegen_flags: <defaults>
</compile_context>

<pallas_src>
import functools

import jax
import jax.numpy as jnp
from jax.experimental import pallas as pl
from jax.experimental.pallas import tpu as pltpu


# ----------------------------------------------------------------------------
# VMEM budget (generation aware) and compiler params
# ----------------------------------------------------------------------------
def _vmem_cap_bytes():
    """~75% of physical VMEM: ~48 MiB on v7x (64 MiB), ~96 MiB on v5e/v6e."""
    phys = 64 * 1024 * 1024          # conservative fallback (v7x-sized)
    try:
        info = pltpu.get_tpu_info()
        phys = int(getattr(info, "vmem_capacity_bytes", phys)) or phys
    except Exception:
        pass
    return max((phys * 3) // 4, 32 * 1024 * 1024)


def _compiler_params(dim_semantics, vmem_cap):
    return pltpu.CompilerParams(dimension_semantics=dim_semantics,
                                vmem_limit_bytes=int(vmem_cap))


def _pick_hw_tile(hw, stream_bytes_per_lane, live_bytes_per_lane, vmem_cap,
                  target_bytes=4 << 20):
    """HW lanes per grid step: ~target streamed bytes, capped by the VMEM
    budget (double-buffered streams + live f32 intermediate), multiple of 128."""
    hw_128 = ((hw + 127) // 128) * 128
    t_target = max(target_bytes // stream_bytes_per_lane, 128)
    denom = 2 * stream_bytes_per_lane + live_bytes_per_lane
    t_vmem = max(((vmem_cap * 3) // 4) // denom, 128)
    t = min(t_target, t_vmem, hw_128)
    t -= t % 128
    return max(t, 128)


# ----------------------------------------------------------------------------
# Fused single-pass kernel: grid=(B,), g/x read from HBM exactly once.
# ----------------------------------------------------------------------------
def _fused_kernel(g_ref, x_ref, wg_ref, wx_ref, b_ref, fc1t_ref, fc2_ref,
                  wpsi_ref, bpsi_ref, out_ref, a_ref, *, inv_hw):
    # a = relu(Wg@g + Wx@x + b) over the full (F_int, HW) slab, cached in VMEM.
    a_ref[...] = jnp.maximum(
        jnp.dot(wg_ref[...], g_ref[0], preferred_element_type=jnp.float32)
        + jnp.dot(wx_ref[...], x_ref[0], preferred_element_type=jnp.float32)
        + b_ref[...], 0.0)

    # SE squeeze (global spatial mean) + excitation MLP, on VPU/XLU only
    # (no tiny N=1 MXU matmuls): fc1 is passed transposed as (F_int, hidden).
    mean = jnp.sum(a_ref[...], axis=1, keepdims=True) * inv_hw        # (F_int,1)
    h = jnp.maximum(jnp.sum(fc1t_ref[...] * mean, axis=0, keepdims=True), 0.0)
    s = jax.nn.sigmoid(jnp.sum(fc2_ref[...] * h, axis=1, keepdims=True))

    # psi head with the SE channel scale folded into the per-channel weight:
    # logit = sum_c (a*s)_c * wpsi_c = sum_c a_c * (s*wpsi)_c
    s_eff = s * wpsi_ref[...]                                          # (F_int,1)
    logit = jnp.sum(a_ref[...] * s_eff, axis=0, keepdims=True) + bpsi_ref[0, 0]
    psi = jax.nn.sigmoid(logit)                                        # (1, HW)
    out_ref[0] = (x_ref[0] * psi).astype(out_ref.dtype)


# ----------------------------------------------------------------------------
# Fallback phase 1: per-channel spatial sums of relu(Wg@g + Wx@x + b)
# ----------------------------------------------------------------------------
def _se_sum_kernel(g_ref, x_ref, wg_ref, wx_ref, b_ref, sum_ref):
    @pl.when(pl.program_id(1) == 0)
    def _():
        sum_ref[...] = jnp.zeros_like(sum_ref)

    a = (jnp.dot(wg_ref[...], g_ref[0], preferred_element_type=jnp.float32)
         + jnp.dot(wx_ref[...], x_ref[0], preferred_element_type=jnp.float32)
         + b_ref[...])
    a = jnp.maximum(a, 0.0)                                   # (F_int, T)
    sum_ref[0] = sum_ref[0] + jnp.sum(a, axis=1, keepdims=True)


# ----------------------------------------------------------------------------
# Fallback phase 2: recompute a, psi head with folded SE scale, gating
# ----------------------------------------------------------------------------
def _apply_kernel(g_ref, x_ref, seff_ref, wg_ref, wx_ref, b_ref, bpsi_ref,
                  out_ref):
    a = jnp.maximum(
        jnp.dot(wg_ref[...], g_ref[0], preferred_element_type=jnp.float32)
        + jnp.dot(wx_ref[...], x_ref[0], preferred_element_type=jnp.float32)
        + b_ref[...], 0.0)                                    # (F_int, T)
    # SE scale already folded into seff = s * wpsi -> single sublane reduce.
    logit = jnp.sum(a * seff_ref[0], axis=0, keepdims=True) + bpsi_ref[0, 0]
    psi = jax.nn.sigmoid(logit)                               # (1, T)
    out_ref[0] = (x_ref[0] * psi).astype(out_ref.dtype)       # lane-dense store


# ----------------------------------------------------------------------------
# Wrapper: NCHW in / NCHW out (channels-first throughout, no HBM transposes)
# ----------------------------------------------------------------------------
def attention_block_pallas(g_nchw, x_nchw, params, *, force_two_phase=False):
    B, F_g, H, W = g_nchw.shape
    _, F_l, _, _ = x_nchw.shape
    HW = H * W
    F_int = params["wg"].shape[0]
    hidden = params["fc1_t"].shape[1]

    g2 = g_nchw.reshape(B, F_g, HW)     # free reshape (contiguous)
    x2 = x_nchw.reshape(B, F_l, HW)

    wg, wx, b_int = params["wg"], params["wx"], params["b_int"]
    fc1_t, fc2_w = params["fc1_t"], params["fc2_w"]
    wpsi, bpsi = params["wpsi"], params["bpsi"]

    itemsize = jnp.dtype(x_nchw.dtype).itemsize
    cap = _vmem_cap_bytes()
    full2 = lambda *_: (0, 0)

    weight_bytes = 4 * (F_int * (F_g + F_l + 2 + 2 * hidden) + 1)
    fused_bytes = (2 * (F_g + 2 * F_l) * HW * itemsize    # dbl-buffered g/x/out
                   + 4 * F_int * HW                       # f32 `a` scratch
                   + weight_bytes + (2 << 20))            # Mosaic headroom

    if not force_two_phase and fused_bytes <= cap:
        # ---------------- single pass: one launch, one HBM read of g/x -------
        flops = int(B * HW * (2 * F_int * (F_g + F_l) + 4 * F_int + 2 * F_l))
        bytes_acc = int(B * HW * (F_g + 2 * F_l) * itemsize + weight_bytes)
        out = pl.pallas_call(
            functools.partial(_fused_kernel, inv_hw=1.0 / HW),
            out_shape=jax.ShapeDtypeStruct((B, F_l, HW), x_nchw.dtype),
            grid_spec=pltpu.PrefetchScalarGridSpec(
                num_scalar_prefetch=0,
                grid=(B,),
                in_specs=[
                    pl.BlockSpec((1, F_g, HW), lambda b: (b, 0, 0)),
                    pl.BlockSpec((1, F_l, HW), lambda b: (b, 0, 0)),
                    pl.BlockSpec((F_int, F_g), full2),
                    pl.BlockSpec((F_int, F_l), full2),
                    pl.BlockSpec((F_int, 1), full2),
                    pl.BlockSpec((F_int, hidden), full2),
                    pl.BlockSpec((F_int, hidden), full2),
                    pl.BlockSpec((F_int, 1), full2),
                    pl.BlockSpec(memory_space=pltpu.MemorySpace.SMEM),  # bpsi
                ],
                out_specs=pl.BlockSpec((1, F_l, HW), lambda b: (b, 0, 0)),
                scratch_shapes=[pltpu.VMEM((F_int, HW), jnp.float32)],
            ),
            compiler_params=_compiler_params(("parallel",), cap),
            cost_estimate=pl.CostEstimate(flops=flops,
                                          transcendentals=int(B * (HW + F_int)),
                                          bytes_accessed=bytes_acc),
        )(g2, x2, wg, wx, b_int, fc1_t, fc2_w, wpsi, bpsi)
        return out.reshape(B, F_l, H, W)

    # ---------------- fallback: two passes over byte-budgeted HW tiles -------
    stream2 = (F_g + 2 * F_l) * itemsize        # phase-2 streamed bytes / lane
    T = _pick_hw_tile(HW, stream2, 4 * F_int, cap)
    HW_pad = ((HW + T - 1) // T) * T
    n_pad = HW_pad - HW
    n_t = HW_pad // T

    if n_pad:
        # TODO(synk): a masked last tile (lane iota vs true HW) would avoid the
        # padded-copy HBM traffic; zero padding keeps both kernels branch-free.
        g2 = jnp.pad(g2, ((0, 0), (0, 0), (0, n_pad)))
        x2 = jnp.pad(x2, ((0, 0), (0, 0), (0, n_pad)))

    flops1 = int(B * HW_pad * (2 * F_int * (F_g + F_l) + 2 * F_int))
    bytes1 = int(B * HW_pad * (F_g + F_l) * itemsize + weight_bytes
                 + 4 * B * F_int)
    sums = pl.pallas_call(
        _se_sum_kernel,
        out_shape=jax.ShapeDtypeStruct((B, F_int, 1), jnp.float32),
        grid_spec=pltpu.PrefetchScalarGridSpec(
            num_scalar_prefetch=0,
            grid=(B, n_t),
            in_specs=[
                pl.BlockSpec((1, F_g, T), lambda b, t: (b, 0, t)),
                pl.BlockSpec((1, F_l, T), lambda b, t: (b, 0, t)),
                pl.BlockSpec((F_int, F_g), full2),
                pl.BlockSpec((F_int, F_l), full2),
                pl.BlockSpec((F_int, 1), full2),
            ],
            out_specs=pl.BlockSpec((1, F_int, 1), lambda b, t: (b, 0, 0)),
        ),
        # TODO(synk): on v7x with B == 1 phase 1 has no parallel axis of
        # extent >= 2; a leading size-2 HW-superchunk split would use both TCs.
        compiler_params=_compiler_params(("parallel", "arbitrary"), cap),
        cost_estimate=pl.CostEstimate(flops=flops1, transcendentals=0,
                                      bytes_accessed=bytes1),
    )(g2, x2, wg, wx, b_int)

    # SE excitation (tiny, plain JAX, f32).  Padded columns contributed exactly
    # relu(b_int) each to the sums; remove them analytically before the mean.
    if n_pad:
        sums = sums - n_pad * jnp.maximum(b_int, 0.0)[None]
    mean = sums[:, :, 0] * (1.0 / HW)                          # (B, F_int)
    h = jnp.maximum(mean @ fc1_t, 0.0)                         # (B, hidden)
    s = jax.nn.sigmoid(h @ fc2_w.T)                            # (B, F_int)
    # SE scale folded into the psi weight -> one operand, no extra VPU multiply.
    s_eff = (s * wpsi[:, 0][None, :])[:, :, None].astype(jnp.float32)

    flops2 = int(B * HW_pad * (2 * F_int * (F_g + F_l) + 3 * F_int + 2 * F_l))
    bytes2 = int(B * HW_pad * (F_g + 2 * F_l) * itemsize + weight_bytes
                 + 4 * B * F_int)
    out = pl.pallas_call(
        _apply_kernel,
        out_shape=jax.ShapeDtypeStruct((B, F_l, HW_pad), x_nchw.dtype),
        grid_spec=pltpu.PrefetchScalarGridSpec(
            num_scalar_prefetch=0,
            grid=(B, n_t),
            in_specs=[
                pl.BlockSpec((1, F_g, T), lambda b, t: (b, 0, t)),
                pl.BlockSpec((1, F_l, T), lambda b, t: (b, 0, t)),
                pl.BlockSpec((1, F_int, 1), lambda b, t: (b, 0, 0)),
                pl.BlockSpec((F_int, F_g), full2),
                pl.BlockSpec((F_int, F_l), full2),
                pl.BlockSpec((F_int, 1), full2),
                pl.BlockSpec(memory_space=pltpu.MemorySpace.SMEM),  # bpsi
            ],
            out_specs=pl.BlockSpec((1, F_l, T), lambda b, t: (b, 0, t)),
        ),
        compiler_params=_compiler_params(("parallel", "parallel"), cap),
        cost_estimate=pl.CostEstimate(flops=flops2,
                                      transcendentals=int(B * HW_pad),
                                      bytes_accessed=bytes2),
    )(g2, x2, s_eff, wg, wx, b_int, bpsi)

    if n_pad:
        out = out[:, :, :HW]
    return out.reshape(B, F_l, H, W)


# ----------------------------------------------------------------------------
# Deterministic parameter construction (mirrors the PyTorch module shapes) and
# BN folding into the 1x1 convs (channels-first orientation).
# ----------------------------------------------------------------------------
def make_params(key, F_g, F_l, F_int, reduction=16, eps=1e-5):
    hidden = max(F_int // reduction, 1)
    ks = jax.random.split(key, 16)

    def nrm(k, shape, scale=0.1):
        return scale * jax.random.normal(k, shape, dtype=jnp.float32)

    raw = dict(
        conv_g_w=nrm(ks[0], (F_int, F_g)),
        conv_g_b=nrm(ks[1], (F_int,)),
        bn_g_gamma=1.0 + nrm(ks[2], (F_int,)),
        bn_g_beta=nrm(ks[3], (F_int,)),
        bn_g_rm=nrm(ks[4], (F_int,)),
        bn_g_rv=jax.random.uniform(ks[5], (F_int,), minval=0.5, maxval=1.5),
        conv_x_w=nrm(ks[6], (F_int, F_l)),
        conv_x_b=nrm(ks[7], (F_int,)),
        bn_x_gamma=1.0 + nrm(ks[8], (F_int,)),
        bn_x_beta=nrm(ks[9], (F_int,)),
        bn_x_rm=nrm(ks[10], (F_int,)),
        bn_x_rv=jax.random.uniform(ks[11], (F_int,), minval=0.5, maxval=1.5),
        fc1_w=nrm(ks[12], (hidden, F_int)),
        fc2_w=nrm(ks[13], (F_int, hidden)),
        conv_p_w=nrm(ks[14], (1, F_int)),
        conv_p_b=nrm(ks[15], (1,)),
        bn_p_gamma=jnp.array([1.3], dtype=jnp.float32),
        bn_p_beta=jnp.array([-0.2], dtype=jnp.float32),
        bn_p_rm=jnp.array([0.05], dtype=jnp.float32),
        bn_p_rv=jnp.array([0.9], dtype=jnp.float32),
    )

    def fold(conv_w, conv_b, gamma, beta, rm, rv):
        scale = gamma / jnp.sqrt(rv + eps)
        w = conv_w * scale[:, None]
        b = ((conv_b - rm) * scale + beta)[:, None]
        return w, b

    wg, bg = fold(raw["conv_g_w"], raw["conv_g_b"], raw["bn_g_gamma"],
                  raw["bn_g_beta"], raw["bn_g_rm"], raw["bn_g_rv"])
    wx, bx = fold(raw["conv_x_w"], raw["conv_x_b"], raw["bn_x_gamma"],
                  raw["bn_x_beta"], raw["bn_x_rm"], raw["bn_x_rv"])
    wp, bp = fold(raw["conv_p_w"], raw["conv_p_b"], raw["bn_p_gamma"],
                  raw["bn_p_beta"], raw["bn_p_rm"], raw["bn_p_rv"])

    folded = dict(
        wg=wg, wx=wx,                 # (F_int, F_g), (F_int, F_l)
        b_int=bg + bx,                # fused conv+BN bias (F_int, 1)
        fc1_t=raw["fc1_w"].T,         # (F_int, hidden)
        fc2_w=raw["fc2_w"],           # (F_int, hidden)
        wpsi=wp.T,                    # (F_int, 1)
        bpsi=bp.reshape(1, 1),        # (1, 1)
    )
    return raw, folded


# ----------------------------------------------------------------------------
# Pure-JAX reference (unfolded BN, NCHW) to validate the kernels.
# ----------------------------------------------------------------------------
def attention_block_reference(g, x, raw, eps=1e-5):
    def conv_bn(inp, w, b, gamma, beta, rm, rv):
        y = jnp.einsum("bchw,oc->bohw", inp, w) + b[None, :, None, None]
        scale = gamma / jnp.sqrt(rv + eps)
        return (y - rm[None, :, None, None]) * scale[None, :, None, None] \
            + beta[None, :, None, None]

    g1 = conv_bn(g, raw["conv_g_w"], raw["conv_g_b"], raw["bn_g_gamma"],
                 raw["bn_g_beta"], raw["bn_g_rm"], raw["bn_g_rv"])
    x1 = conv_bn(x, raw["conv_x_w"], raw["conv_x_b"], raw["bn_x_gamma"],
                 raw["bn_x_beta"], raw["bn_x_rm"], raw["bn_x_rv"])
    a = jnp.maximum(g1 + x1, 0.0)

    m = a.mean(axis=(2, 3))                                  # (B, F_int)
    h = jnp.maximum(m @ raw["fc1_w"].T, 0.0)
    s = jax.nn.sigmoid(h @ raw["fc2_w"].T)
    a = a * s[:, :, None, None]

    psi = jax.nn.sigmoid(
        conv_bn(a, raw["conv_p_w"], raw["conv_p_b"], raw["bn_p_gamma"],
                raw["bn_p_beta"], raw["bn_p_rm"], raw["bn_p_rv"]))
    return x * psi


if __name__ == "__main__":
    B, F_g, F_l, F_int = 2, 16, 16, 32
    H = W = 16

    key = jax.random.PRNGKey(0)
    kg, kx, kp = jax.random.split(key, 3)
    g = jax.random.normal(kg, (B, F_g, H, W), dtype=jnp.float32)
    x = jax.random.normal(kx, (B, F_l, H, W), dtype=jnp.float32)
    raw_params, folded_params = make_params(kp, F_g, F_l, F_int)

    fwd = jax.jit(attention_block_pallas, static_argnames=("force_two_phase",))
    ref = attention_block_reference(g, x, raw_params)

    # fused single-pass path (default for shapes that fit VMEM)
    out_fused = jax.block_until_ready(fwd(g, x, folded_params))
    assert out_fused.shape == ref.shape == (B, F_l, H, W)
    assert jnp.allclose(out_fused, ref, rtol=1e-5, atol=1e-5), (
        float(jnp.max(jnp.abs(out_fused - ref))))

    # two-phase fallback path (used for large spatial extents)
    out_split = jax.block_until_ready(fwd(g, x, folded_params,
                                          force_two_phase=True))
    assert jnp.allclose(out_split, ref, rtol=1e-5, atol=1e-5), (
        float(jnp.max(jnp.abs(out_split - ref))))

    # ragged spatial extent exercises padding + SE-sum correction
    Hr = Wr = 10
    gr = jax.random.normal(kg, (B, F_g, Hr, Wr), dtype=jnp.float32)
    xr = jax.random.normal(kx, (B, F_l, Hr, Wr), dtype=jnp.float32)
    out_r = jax.block_until_ready(fwd(gr, xr, folded_params,
                                      force_two_phase=True))
    ref_r = attention_block_reference(gr, xr, raw_params)
    assert jnp.allclose(out_r, ref_r, rtol=1e-5, atol=1e-5), (
        float(jnp.max(jnp.abs(out_r - ref_r))))

    print("KERNEL_OK")
</pallas_src>

<mosaic_0001>
module attributes {stable_mosaic.version = 11 : i64} {
  func.func @_fused_kernel(%arg0: i32, %arg1: memref<1x16x256xf32, #tpu.memory_space<vmem>>, %arg2: memref<1x16x256xf32, #tpu.memory_space<vmem>>, %arg3: memref<32x16xf32, #tpu.memory_space<vmem>>, %arg4: memref<32x16xf32, #tpu.memory_space<vmem>>, %arg5: memref<32x1xf32, #tpu.memory_space<vmem>>, %arg6: memref<32x2xf32, #tpu.memory_space<vmem>>, %arg7: memref<32x2xf32, #tpu.memory_space<vmem>>, %arg8: memref<32x1xf32, #tpu.memory_space<vmem>>, %arg9: memref<1x1xf32, #tpu.memory_space<smem>>, %arg10: memref<1x16x256xf32, #tpu.memory_space<vmem>>, %arg11: memref<32x256xf32, #tpu.memory_space<vmem>>) attributes {dimension_semantics = [#tpu.dimension_semantics<parallel>], iteration_bounds = array<i64: 2>, scalar_prefetch = 0 : i64, scratch_operands = 1 : i64, tpu.core_type = #tpu.core_type<tc>, window_params = [{transform_indices = @transform_0, window_bounds = array<i64: 1, 16, 256>}, {transform_indices = @transform_1, window_bounds = array<i64: 1, 16, 256>}, {pipeline_mode = #tpu.pipeline_mode<synchronous>, transform_indices = @transform_2, window_bounds = array<i64: 32, 16>}, {pipeline_mode = #tpu.pipeline_mode<synchronous>, transform_indices = @transform_3, window_bounds = array<i64: 32, 16>}, {pipeline_mode = #tpu.pipeline_mode<synchronous>, transform_indices = @transform_4, window_bounds = array<i64: 32, 1>}, {pipeline_mode = #tpu.pipeline_mode<synchronous>, transform_indices = @transform_5, window_bounds = array<i64: 32, 2>}, {pipeline_mode = #tpu.pipeline_mode<synchronous>, transform_indices = @transform_6, window_bounds = array<i64: 32, 2>}, {pipeline_mode = #tpu.pipeline_mode<synchronous>, transform_indices = @transform_7, window_bounds = array<i64: 32, 1>}, {transform_indices = @transform_8, window_bounds = array<i64: 1, 1>}, {transform_indices = @transform_9, window_bounds = array<i64: 1, 16, 256>}]} {
    %c0 = arith.constant 0 : index
    %c0_0 = arith.constant 0 : index
    %0 = vector.load %arg3[%c0, %c0_0] : memref<32x16xf32, #tpu.memory_space<vmem>>, vector<32x16xf32>
    %c0_1 = arith.constant 0 : index
    %c0_2 = arith.constant 0 : index
    %c0_3 = arith.constant 0 : index
    %1 = vector.load %arg1[%c0_1, %c0_2, %c0_3] : memref<1x16x256xf32, #tpu.memory_space<vmem>>, vector<1x16x256xf32>
    %2 = vector.shape_cast %1 : vector<1x16x256xf32> to vector<16x256xf32>
    %cst = arith.constant dense<0.000000e+00> : vector<32x256xf32>
    %3 = tpu.matmul %0, %2, %cst {dimension_numbers = #tpu.dot_dimension_numbers<[1], [0], [0], [1], [0, 0, 1, 1], [], []>} : vector<32x16xf32>, vector<16x256xf32>, vector<32x256xf32> -> vector<32x256xf32>
    %c0_4 = arith.constant 0 : index
    %c0_5 = arith.constant 0 : index
    %4 = vector.load %arg4[%c0_4, %c0_5] : memref<32x16xf32, #tpu.memory_space<vmem>>, vector<32x16xf32>
    %c0_6 = arith.constant 0 : index
    %c0_7 = arith.constant 0 : index
    %c0_8 = arith.constant 0 : index
    %5 = vector.load %arg2[%c0_6, %c0_7, %c0_8] : memref<1x16x256xf32, #tpu.memory_space<vmem>>, vector<1x16x256xf32>
    %6 = vector.shape_cast %5 : vector<1x16x256xf32> to vector<16x256xf32>
    %cst_9 = arith.constant dense<0.000000e+00> : vector<32x256xf32>
    %7 = tpu.matmul %4, %6, %cst_9 {dimension_numbers = #tpu.dot_dimension_numbers<[1], [0], [0], [1], [0, 0, 1, 1], [], []>} : vector<32x16xf32>, vector<16x256xf32>, vector<32x256xf32> -> vector<32x256xf32>
    %8 = arith.addf %3, %7 : vector<32x256xf32>
    %c0_10 = arith.constant 0 : index
    %c0_11 = arith.constant 0 : index
    %9 = vector.load %arg5[%c0_10, %c0_11] : memref<32x1xf32, #tpu.memory_space<vmem>>, vector<32x1xf32>
    %10 = vector.broadcast %9 : vector<32x1xf32> to vector<32x256xf32>
    %11 = arith.addf %8, %10 : vector<32x256xf32>
    %cst_12 = arith.constant 0.000000e+00 : f32
    %12 = vector.broadcast %cst_12 : f32 to vector<32x256xf32>
    %13 = arith.maximumf %11, %12 : vector<32x256xf32>
    %c0_13 = arith.constant 0 : index
    %c0_14 = arith.constant 0 : index
    %14 = vector.load %arg11[%c0_13, %c0_14] : memref<32x256xf32, #tpu.memory_space<vmem>>, vector<32x256xf32>
    tpu.vector_store %arg11[%c0_13, %c0_14], %13 {strides = array<i32>} : memref<32x256xf32, #tpu.memory_space<vmem>>, vector<32x256xf32>,
    %c0_15 = arith.constant 0 : index
    %c0_16 = arith.constant 0 : index
    %15 = vector.load %arg11[%c0_15, %c0_16] : memref<32x256xf32, #tpu.memory_space<vmem>>, vector<32x256xf32>
    %cst_17 = arith.constant dense<0.000000e+00> : vector<32xf32>
    %16 = vector.multi_reduction <add>, %15, %cst_17 [1] : vector<32x256xf32> to vector<32xf32>
    %17 = vector.shape_cast %16 : vector<32xf32> to vector<32x1xf32>
    %cst_18 = arith.constant 3.906250e-03 : f32
    %18 = vector.broadcast %cst_18 : f32 to vector<32x1xf32>
    %19 = arith.mulf %17, %18 : vector<32x1xf32>
    %c0_19 = arith.constant 0 : index
    %c0_20 = arith.constant 0 : index
    %20 = vector.load %arg6[%c0_19, %c0_20] : memref<32x2xf32, #tpu.memory_space<vmem>>, vector<32x2xf32>
    %21 = vector.broadcast %19 : vector<32x1xf32> to vector<32x2xf32>
    %22 = arith.mulf %20, %21 : vector<32x2xf32>
    %cst_21 = arith.constant dense<0.000000e+00> : vector<2xf32>
    %23 = vector.multi_reduction <add>, %22, %cst_21 [0] : vector<32x2xf32> to vector<2xf32>
    %24 = vector.shape_cast %23 : vector<2xf32> to vector<1x2xf32>
    %cst_22 = arith.constant 0.000000e+00 : f32
    %25 = vector.broadcast %cst_22 : f32 to vector<1x2xf32>
    %26 = arith.maximumf %24, %25 : vector<1x2xf32>
    %c0_23 = arith.constant 0 : index
    %c0_24 = arith.constant 0 : index
    %27 = vector.load %arg7[%c0_23, %c0_24] : memref<32x2xf32, #tpu.memory_space<vmem>>, vector<32x2xf32>
    %28 = vector.broadcast %26 : vector<1x2xf32> to vector<32x2xf32>
    %29 = arith.mulf %27, %28 : vector<32x2xf32>
    %cst_25 = arith.constant dense<0.000000e+00> : vector<32xf32>
    %30 = vector.multi_reduction <add>, %29, %cst_25 [1] : vector<32x2xf32> to vector<32xf32>
    %31 = vector.shape_cast %30 : vector<32xf32> to vector<32x1xf32>
    %32 = arith.negf %31 : vector<32x1xf32>
    %33 = math.exp %32 : vector<32x1xf32>
    %cst_26 = arith.constant 1.000000e+00 : f32
    %34 = vector.broadcast %cst_26 : f32 to vector<32x1xf32>
    %35 = arith.addf %34, %33 : vector<32x1xf32>
    %36 = arith.divf %34, %35 : vector<32x1xf32>
    %c0_27 = arith.constant 0 : index
    %c0_28 = arith.constant 0 : index
    %37 = vector.load %arg8[%c0_27, %c0_28] : memref<32x1xf32, #tpu.memory_space<vmem>>, vector<32x1xf32>
    %38 = arith.mulf %36, %37 : vector<32x1xf32>
    %c0_29 = arith.constant 0 : index
    %c0_30 = arith.constant 0 : index
    %39 = vector.load %arg11[%c0_29, %c0_30] : memref<32x256xf32, #tpu.memory_space<vmem>>, vector<32x256xf32>
    %40 = vector.broadcast %38 : vector<32x1xf32> to vector<32x256xf32>
    %41 = arith.mulf %39, %40 : vector<32x256xf32>
    %cst_31 = arith.constant dense<0.000000e+00> : vector<256xf32>
    %42 = vector.multi_reduction <add>, %41, %cst_31 [0] : vector<32x256xf32> to vector<256xf32>
    %43 = vector.shape_cast %42 : vector<256xf32> to vector<1x256xf32>
    %c0_32 = arith.constant 0 : index
    %c0_33 = arith.constant 0 : index
    %44 = memref.load %arg9[%c0_32, %c0_33] : memref<1x1xf32, #tpu.memory_space<smem>>
    %45 = vector.broadcast %44 : f32 to vector<1x256xf32>
    %46 = arith.addf %43, %45 : vector<1x256xf32>
    %47 = arith.negf %46 : vector<1x256xf32>
    %48 = math.exp %47 : vector<1x256xf32>
    %cst_34 = arith.constant 1.000000e+00 : f32
    %49 = vector.broadcast %cst_34 : f32 to vector<1x256xf32>
    %50 = arith.addf %49, %48 : vector<1x256xf32>
    %51 = arith.divf %49, %50 : vector<1x256xf32>
    %c0_35 = arith.constant 0 : index
    %c0_36 = arith.constant 0 : index
    %c0_37 = arith.constant 0 : index
    %52 = vector.load %arg2[%c0_35, %c0_36, %c0_37] : memref<1x16x256xf32, #tpu.memory_space<vmem>>, vector<1x16x256xf32>
    %53 = vector.shape_cast %52 : vector<1x16x256xf32> to vector<16x256xf32>
    %54 = vector.broadcast %51 : vector<1x256xf32> to vector<16x256xf32>
    %55 = arith.mulf %53, %54 : vector<16x256xf32>
    %c0_38 = arith.constant 0 : index
    %c0_39 = arith.constant 0 : index
    %c0_40 = arith.constant 0 : index
    %56 = vector.load %arg10[%c0_38, %c0_39, %c0_40] : memref<1x16x256xf32, #tpu.memory_space<vmem>>, vector<1x16x256xf32>
    %57 = vector.shape_cast %56 : vector<1x16x256xf32> to vector<16x256xf32>
    %58 = vector.shape_cast %55 : vector<16x256xf32> to vector<1x16x256xf32>
    tpu.vector_store %arg10[%c0_38, %c0_39, %c0_40], %58 {strides = array<i32>} : memref<1x16x256xf32, #tpu.memory_space<vmem>>, vector<1x16x256xf32>,
    return
  }
  func.func @transform_0(%arg0: i32) -> (i32, i32, i32) {
    %c0_i32 = arith.constant 0 : i32
    %c0_i32_0 = arith.constant 0 : i32
    %c0_i32_1 = arith.constant 0 : i32
    return %arg0, %c0_i32, %c0_i32_0 : i32, i32, i32
  }
  func.func @transform_1(%arg0: i32) -> (i32, i32, i32) {
    %c0_i32 = arith.constant 0 : i32
    %c0_i32_0 = arith.constant 0 : i32
    %c0_i32_1 = arith.constant 0 : i32
    return %arg0, %c0_i32, %c0_i32_0 : i32, i32, i32
  }
  func.func @transform_2(%arg0: i32) -> (i32, i32) {
    %c0_i32 = arith.constant 0 : i32
    %c0_i32_0 = arith.constant 0 : i32
    %c0_i32_1 = arith.constant 0 : i32
    return %c0_i32, %c0_i32_0 : i32, i32
  }
  func.func @transform_3(%arg0: i32) -> (i32, i32) {
    %c0_i32 = arith.constant 0 : i32
    %c0_i32_0 = arith.constant 0 : i32
    %c0_i32_1 = arith.constant 0 : i32
    return %c0_i32, %c0_i32_0 : i32, i32
  }
  func.func @transform_4(%arg0: i32) -> (i32, i32) {
    %c0_i32 = arith.constant 0 : i32
    %c0_i32_0 = arith.constant 0 : i32
    %c0_i32_1 = arith.constant 0 : i32
    return %c0_i32, %c0_i32_0 : i32, i32
  }
  func.func @transform_5(%arg0: i32) -> (i32, i32) {
    %c0_i32 = arith.constant 0 : i32
    %c0_i32_0 = arith.constant 0 : i32
    %c0_i32_1 = arith.constant 0 : i32
    return %c0_i32, %c0_i32_0 : i32, i32
  }
  func.func @transform_6(%arg0: i32) -> (i32, i32) {
    %c0_i32 = arith.constant 0 : i32
    %c0_i32_0 = arith.constant 0 : i32
    %c0_i32_1 = arith.constant 0 : i32
    return %c0_i32, %c0_i32_0 : i32, i32
  }
  func.func @transform_7(%arg0: i32) -> (i32, i32) {
    %c0_i32 = arith.constant 0 : i32
    %c0_i32_0 = arith.constant 0 : i32
    %c0_i32_1 = arith.constant 0 : i32
    return %c0_i32, %c0_i32_0 : i32, i32
  }
  func.func @transform_8(%arg0: i32) -> (i32, i32) {
    %c0_i32 = arith.constant 0 : i32
    %c0_i32_0 = arith.constant 0 : i32
    %c0_i32_1 = arith.constant 0 : i32
    return %c0_i32, %c0_i32_0 : i32, i32
  }
  func.func @transform_9(%arg0: i32) -> (i32, i32, i32) {
    %c0_i32 = arith.constant 0 : i32
    %c0_i32_0 = arith.constant 0 : i32
    %c0_i32_1 = arith.constant 0 : i32
    return %arg0, %c0_i32, %c0_i32_0 : i32, i32, i32
  }
}

</mosaic_0001>

<bundles_post_ra>
// kernel: attention_block_pallas.1
= control target key start
LH: loop header
LB: loop body
LE: loop exit
PB: predicated region body
PF: predicated region fallthrough
CT: control target
= control target key end

     0   :  { %s990_s11 = smov 0   ;;  %s1175_s0 = inlined_call_operand.vmem [shape: f32[2,16,256], index: 0, kind: input, shape index: {}]   ;;  %s1176_s1 = inlined_call_operand.vmem [shape: f32[2,16,256], index: 1, kind: input, shape index: {}]   ;;  %s1177_s2 = inlined_call_operand.vmem [shape: f32[32,16], index: 2, kind: input, shape index: {}]   ;;  %s1178_s3 = inlined_call_operand.vmem [shape: f32[32,16], index: 3, kind: input, shape index: {}]   ;;  %s1179_s4 = inlined_call_operand.vmem [shape: f32[32,1], index: 4, kind: input, shape index: {}]   ;;  %s1180_s5 = inlined_call_operand.vmem [shape: f32[32,2], index: 5, kind: input, shape index: {}]   ;;  %s1181_s6 = inlined_call_operand.vmem [shape: f32[32,2], index: 6, kind: input, shape index: {}]   ;;  %s1182_s7 = inlined_call_operand.vmem [shape: f32[32,1], index: 7, kind: input, shape index: {}]   ;;  %s1183_s8 = inlined_call_operand.<no memory space> [shape: f32[1,1], index: 8, kind: input, shape index: {}]   ;;  %s1184_s9 = inlined_call_operand.vmem [shape: f32[2,16,256], index: 9, kind: output, shape index: {}]  }
   0x1   :  { %14 = sst [smem:[#allocation3]] %s1183_s8 }
   0x2 LB: > { %s861_s12 = sadd.s32 4294967295, %s933_s11   ;;  %p865_p0 = scmp.ge.s32.totalorder %s933_s11, 1  ;;  %s933_s11 = sphi %s990_s11, %s20_s11  }
   0x3   : > { %p298_p1 = scmp.lt.s32.totalorder %s933_s11, 3 }
   0x5   : > { %p299_p2 = pnand %p865_p0, %p298_p1 }
   0x6   : > { %p339_p3 = scmp.lt.s32.totalorder (!%p299_p2), %s861_s12, 1  ;;  %s766_s27 = sld [smem:[#allocation3]] (!%p299_p2) }
   0x7   : > { %302 = sbr.rel (%p299_p2) target bundleno = 757 (0x2f5), region = 56 }
   0xc   : > { %v935_v0 = vmov 0.0   ;;  %s1186_s12 = smov (!%p339_p3, %s861_s12), 1  ;;  %v936_v1 = vmov 0   ;;  %v573_v2 = vld [vmem:[%s1179_s4] sm:$0xff]  ;;  %v575_v3 = vld [vmem:[%s1179_s4 + $0x10] sm:$0xff]  ;;  %v574_v4 = vld [vmem:[%s1179_s4 + $0x8] sm:$0xff] }
   0xd   : > { %447 = vmatprep.mubr.f32.mxu0 %v935_v0  ;;  %548 = vmatprep.mubr.f32.mxu1 %v935_v0  ;;  %s1004_s16 = sshll.u32 %s1186_s12, 5  ;;  %v362_v13 = vld [vmem:[%s1178_s3] sm:$0xff]  ;;  %vm370_vm0 = vcmask 130048   ;;  %v576_v15 = vld [vmem:[%s1179_s4 + $0x18] sm:$0xff]  ;;  %v363_v16 = vld [vmem:[%s1178_s3 + $0x8] sm:$0xff]  ;;  %vm653_vm1 = vcmask 15360  }
   0xe   : > { %901 = vset.pattern.permute.xlu0 %v936_v1  ;;  %902 = vset.pattern.permute.xlu1 %v936_v1  ;;  %s348_s21 = scalar_lea.vmem %s1176_s1, %s1004_s16  ;;  %s343_s24 = scalar_lea.vmem %s1175_s0, %s1004_s16  ;;  %v354_v14 = vld [vmem:[%s1177_s2] sm:$0xff]  ;;  %v355_v17 = vld [vmem:[%s1177_s2 + $0x8] sm:$0xff]  ;;  %v364_v18 = vld [vmem:[%s1178_s3 + $0x10] sm:$0xff] }
   0xf   : > { %579 = vperm.xlu0 %901, %v573_v2   ;;  %589 = vperm.xlu1 %902, %v575_v3   ;;  %v1013_v5 = vld [vmem:[%s348_s21 + $0x18] sm:$0xff]  ;;  %v1019_v6 = vld [vmem:[%s348_s21 + $0x10] sm:$0xff]  ;;  %v1021_v7 = vld [vmem:[%s348_s21 + $0x8] sm:$0xff]  ;;  %s353_s30 = scalar_lea.vmem %s1184_s9, %s1004_s16 }
  0x10   : > { %411 = vmatprep.subr.mxu0 %v1013_v5  ;;  %v361_v8 = vld [vmem:[%s343_s24 + $0x18] sm:$0xff]  ;;  %v360_v9 = vld [vmem:[%s343_s24 + $0x10] sm:$0xff]  ;;  %v359_v10 = vld [vmem:[%s343_s24 + $0x8] sm:$0xff] }
  0x11   : > { %512 = vmatprep.subr.mxu1 %v361_v8  ;;  %412 = vmatpush1.msra.mxu0 %v1019_v6  ;;  %v1025_v11 = vld [vmem:[%s348_s21] sm:$0xff]  ;;  %v356_v19 = vld [vmem:[%s1177_s2 + $0x10] sm:$0xff]  ;;  %v365_v20 = vld [vmem:[%s1178_s3 + $0x18] sm:$0xff] }
  0x12   : > { %v358_v12 = vld [vmem:[%s343_s24] sm:$0xff]  ;;  %513 = vmatpush1.msra.mxu1 %v360_v9  ;;  %413 = vmatprep.subr.mxu0 %v1021_v7  ;;  %v357_v21 = vld [vmem:[%s1177_s2 + $0x18] sm:$0xff] }
  0x13   : > { %584 = vperm.xlu0 %901, %v574_v4   ;;  %514 = vmatprep.subr.mxu1 %v359_v10  ;;  %v646_v10 = vld [vmem:[%s1180_s5 + $0x8] sm:$0xff] }
  0x14   : > { %414 = vmatpush1.msra.mxu0 %v1025_v11  ;;  %515 = vmatpush1.msra.mxu1 %v358_v12 }
  0x15   : > { %872 = vmatmul.mubr.msk.f32.vlgmr.msra.gmra.mxu0 %vm370_vm0, %v362_v13  ;;  %876 = vmatmul.mubr.msk.f32.vlgmr.msra.gmra.mxu1 %vm370_vm0, %v354_v14 }
  0x16   : > { %453 = vmatprep.mubr.f32.mxu0 %v935_v0  ;;  %554 = vmatprep.mubr.f32.mxu1 %v935_v0 }
  0x17   : > { %594 = vperm.xlu1 %902, %v576_v15   ;;  %v645_v15 = vld [vmem:[%s1180_s5] sm:$0xff] }
  0x19   : > { %873 = vmatmul.mubr.msk.f32.gmra.mxu0 %vm370_vm0, %v363_v16  ;;  %877 = vmatmul.mubr.msk.f32.gmra.mxu1 %vm370_vm0, %v355_v17  ;;  %v647_v17 = vld [vmem:[%s1180_s5 + $0x10] sm:$0xff] }
  0x1a   : > { %459 = vmatprep.mubr.f32.mxu0 %v935_v0  ;;  %560 = vmatprep.mubr.f32.mxu1 %v935_v0 }
  0x1d   : > { %874 = vmatmul.mubr.msk.f32.gmra.mxu0 %vm370_vm0, %v364_v18  ;;  %878 = vmatmul.mubr.msk.f32.gmra.mxu1 %vm370_vm0, %v356_v19 }
  0x1e   : > { %465 = vmatprep.mubr.f32.mxu0 %v935_v0  ;;  %566 = vmatprep.mubr.f32.mxu1 %v935_v0 }
  0x21   : > { %875 = vmatmul.mubr.msk.f32.gmra.mxu0 %vm370_vm0, %v365_v20  ;;  %879 = vmatmul.mubr.msk.f32.gmra.mxu1 %vm370_vm0, %v357_v21 }
  0x8a   : > { %v580_v22 = vpop.permute.xlu0 %579  ;;  %v590_v42 = vpop.permute.xlu1 %589 }
  0x8e   : > { %v585_v32 = vpop.permute.xlu0 %584 }
  0x92   : > { %v595_v59 = vpop.permute.xlu1 %594 }
  0xd5   : > { %v449_v23 = vpop.f32.mrf.mxu0  ;;  %v550_v24 = vpop.f32.mrf.mxu1 }
  0xd6   : > { %v551_v25 = vadd.f32 %v550_v24, %v449_v23  ;;  %v648_v23 = vld [vmem:[%s1180_s5 + $0x18] sm:$0xff] }
  0xd7   : > { %v451_v26 = vpop.f32.mrf.mxu0  ;;  %v552_v27 = vpop.f32.mrf.mxu1 }
  0xd8   : > { %v1064_v28 = vadd.f32 %v580_v22, %v551_v25  ;;  %v553_v29 = vadd.f32 %v552_v27, %v451_v26 }
  0xd9   : > { %v455_v30 = vpop.f32.mrf.mxu0  ;;  %v556_v31 = vpop.f32.mrf.mxu1 }
  0xda   : > { %v1066_v33 = vadd.f32 %v580_v22, %v553_v29  ;;  %v557_v34 = vadd.f32 %v556_v31, %v455_v30  ;;  %v605_v37 = vmax.f32 %v1064_v28, 0.0 }
  0xdb   : > { %v457_v35 = vpop.f32.mrf.mxu0  ;;  %v558_v36 = vpop.f32.mrf.mxu1 }
  0xdc   : > { %v606_v38 = vmax.f32 %v1066_v33, 0.0  ;;  %v1070_v39 = vadd.f32 %v585_v32, %v557_v34  ;;  %v559_v40 = vadd.f32 %v558_v36, %v457_v35 }
  0xdd   : > { %v461_v41 = vpop.f32.mrf.mxu0  ;;  %v562_v43 = vpop.f32.mrf.mxu1 }
  0xde   : > { %v1072_v44 = vadd.f32 %v585_v32, %v559_v40  ;;  %v563_v45 = vadd.f32 %v562_v43, %v461_v41  ;;  %v629_v47 = vadd.f32 %v606_v38, %v605_v37  ;;  %v607_v49 = vmax.f32 %v1070_v39, 0.0 }
  0xdf   : > { %v463_v46 = vpop.f32.mrf.mxu0  ;;  %v564_v48 = vpop.f32.mrf.mxu1 }
  0xe0   : > { %v608_v50 = vmax.f32 %v1072_v44, 0.0  ;;  %v1080_v51 = vadd.f32 %v590_v42, %v563_v45  ;;  %v565_v52 = vadd.f32 %v564_v48, %v463_v46  ;;  %630 = vadd.xlane.f32.xlu0 %v629_v47  ;;  %v669_v45 = vld [vmem:[%s1181_s6 + $0x8] sm:$0xff]  ;;  %v668_v46 = vld [vmem:[%s1181_s6] sm:$0xff]  ;;  %v671_v48 = vld [vmem:[%s1181_s6 + $0x18] sm:$0xff] }
  0xe1   : > { %v467_v53 = vpop.f32.mrf.mxu0  ;;  %v568_v54 = vpop.f32.mrf.mxu1 }
  0xe2   : > { %v1082_v55 = vadd.f32 %v590_v42, %v565_v52  ;;  %v569_v56 = vadd.f32 %v568_v54, %v467_v53  ;;  %v632_v58 = vadd.f32 %v608_v50, %v607_v49  ;;  %v609_v61 = vmax.f32 %v1080_v51, 0.0  ;;  %v670_v52 = vld [vmem:[%s1181_s6 + $0x10] sm:$0xff] }
  0xe3   : > { %v469_v57 = vpop.f32.mrf.mxu0  ;;  %v570_v60 = vpop.f32.mrf.mxu1 }
  0xe4   : > { %v610_v62 = vmax.f32 %v1082_v55, 0.0  ;;  %v1090_v63 = vadd.f32 %v595_v59, %v569_v56  ;;  %v571_v0 = vadd.f32 %v570_v60, %v469_v57  ;;  %633 = vadd.xlane.f32.xlu1 %v632_v58 }
  0xe6   : > { %v1092_v1 = vadd.f32 %v595_v59, %v571_v0  ;;  %v635_v2 = vadd.f32 %v610_v62, %v609_v61  ;;  %v611_v3 = vmax.f32 %v1090_v63, 0.0 }
  0xe8   : > { %v612_v4 = vmax.f32 %v1092_v1, 0.0  ;;  %636 = vadd.xlane.f32.xlu0 %v635_v2 }
  0xea   : > { %v638_v8 = vadd.f32 %v612_v4, %v611_v3 }
  0xec   : > { %639 = vadd.xlane.f32.xlu0 %v638_v8 }
 0x169   : > { %v631_v9 = vpop.xlane.xlu0 %630 }
 0x16a   : > { %v641_v13 = vmul.f32 0.00390625, %v631_v9 }
 0x16c   : > { %v649_v19 = vmul.f32 %v645_v15, %v641_v13 }
 0x16d   : > { %v634_v12 = vpop.xlane.xlu1 %633 }
 0x16e   : > { %v642_v14 = vmul.f32 0.00390625, %v634_v12  ;;  %v654_v25 = vsel %vm653_vm1, %v649_v19, 0.0 }
 0x170   : > { %v650_v16 = vmul.f32 %v646_v10, %v642_v14 }
 0x171   : > { %v637_v18 = vpop.xlane.xlu0 %636 }
 0x172   : > { %v643_v20 = vmul.f32 0.00390625, %v637_v18  ;;  %v655_v21 = vsel %vm653_vm1, %v650_v16, 0.0 }
 0x173   : > { %v656_v29 = vadd.f32 %v655_v21, %v654_v25  ;;  %v712_v25 = vld [vmem:[%s1182_s7] sm:$0xff] }
 0x174   : > { %v651_v22 = vmul.f32 %v647_v17, %v643_v20 }
 0x175   : > { %v640_v24 = vpop.xlane.xlu0 %639 }
 0x176   : > { %v657_v26 = vsel %vm653_vm1, %v651_v22, 0.0  ;;  %v644_v27 = vmul.f32 0.00390625, %v640_v24  ;;  %v713_v24 = vld [vmem:[%s1182_s7 + $0x8] sm:$0xff] }
 0x177   : > { %v658_v31 = vadd.f32 %v657_v26, %v656_v29 }
 0x178   : > { %v652_v30 = vmul.f32 %v648_v23, %v644_v27 }
 0x17a   : > { %v659_v32 = vsel %vm653_vm1, %v652_v30, 0.0 }
 0x17b   : > { %v660_v34 = vadd.f32 %v659_v32, %v658_v31  ;;  %v714_v31 = vld [vmem:[%s1182_s7 + $0x10] sm:$0xff] }
 0x17d   : > { %v661_v35 = vrot.slane %v660_v34, 4 }
 0x17f   : > { %v662_v36 = vadd.f32 %v661_v35, %v660_v34 }
 0x181   : > { %v663_v40 = vrot.slane %v662_v36, 2 }
 0x183   : > { %v664_v41 = vadd.f32 %v663_v40, %v662_v36  ;;  %v715_v36 = vld [vmem:[%s1182_s7 + $0x18] sm:$0xff] }
 0x185   : > { %v665_v42 = vrot.slane %v664_v41, 1 }
 0x187   : > { %v666_v43 = vadd.f32 %v665_v42, %v664_v41 }
 0x189   : > { %v667_v47 = vmax.f32 %v666_v43, 0.0 }
 0x18b   : > { %v673_v53 = vmul.f32 %v669_v45, %v667_v47  ;;  %v672_v54 = vmul.f32 %v668_v46, %v667_v47  ;;  %v675_v58 = vmul.f32 %v671_v48, %v667_v47  ;;  %v674_v59 = vmul.f32 %v670_v52, %v667_v47 }
 0x18d   : > { %v679_v56 = vsel %vm653_vm1, %v673_v53, 0.0  ;;  %v676_v57 = vsel %vm653_vm1, %v672_v54, 0.0  ;;  %v685_v60 = vsel %vm653_vm1, %v675_v58, 0.0  ;;  %v682_v0 = vsel %vm653_vm1, %v674_v59, 0.0 }
 0x18e   : > { %680 = vadd.xlane.f32.xlu0 %v679_v56  ;;  %677 = vadd.xlane.f32.xlu1 %v676_v57 }
 0x192   : > { %686 = vadd.xlane.f32.xlu0 %v685_v60  ;;  %683 = vadd.xlane.f32.xlu1 %v682_v0 }
 0x217   : > { %v681_v2 = vpop.xlane.xlu0 %680  ;;  %v678_v8 = vpop.xlane.xlu1 %677 }
 0x218   : > { %v881_v9 = vmul.f32 -1.442695, %v681_v2  ;;  %v880_v10 = vmul.f32 -1.442695, %v678_v8  ;;  %v767_v2 = vstv %s766_s27 }
 0x21a   : > { %903 = vpow2.f32 %v881_v9 }
 0x21b   : > { %905 = vpow2.f32 %v880_v10  ;;  %v687_v12 = vpop.xlane.xlu0 %686  ;;  %v684_v13 = vpop.xlane.xlu1 %683 }
 0x21c   : > { %v883_v14 = vmul.f32 -1.442695, %v687_v12  ;;  %v882_v15 = vmul.f32 -1.442695, %v684_v13 }
 0x21e   : > { %907 = vpow2.f32 %v883_v14 }
 0x21f   : > { %909 = vpow2.f32 %v882_v15 }
 0x227   : > { %v904_v16 = vpop.eup %903 }
 0x228   : > { %v906_v17 = vpop.eup %905  ;;  %v701_v18 = vadd.f32 1.0, %v904_v16 }
 0x229   : > { %v700_v19 = vadd.f32 1.0, %v906_v17 }
 0x22a   : > { %911 = vrcp.f32 %v701_v18 }
 0x22b   : > { %v908_v20 = vpop.eup %907  ;;  %913 = vrcp.f32 %v700_v19 }
 0x22c   : > { %v910_v21 = vpop.eup %909  ;;  %v703_v22 = vadd.f32 1.0, %v908_v20 }
 0x22d   : > { %v702_v23 = vadd.f32 1.0, %v910_v21 }
 0x22f   : > { %915 = vrcp.f32 %v702_v23 }
 0x230   : > { %917 = vrcp.f32 %v703_v22 }
 0x237   : > { %v912_v26 = vpop.eup %911 }
 0x238   : > { %v914_v27 = vpop.eup %913  ;;  %v717_v29 = vmul.f32 %v912_v26, %v713_v24 }
 0x239   : > { %v716_v30 = vmul.f32 %v914_v27, %v712_v25 }
 0x23a   : > { %727 = vperm.xlu0 %901, %v717_v29  }
 0x23b   : > { %722 = vperm.xlu1 %902, %v716_v30  }
 0x23c   : > { %v916_v32 = vpop.eup %915 }
 0x23d   : > { %v718_v34 = vmul.f32 %v916_v32, %v714_v31  ;;  %v918_v35 = vpop.eup %917 }
 0x23e   : > { %v719_v40 = vmul.f32 %v918_v35, %v715_v36 }
 0x23f   : > { %732 = vperm.xlu1 %902, %v718_v34  }
 0x243   : > { %737 = vperm.xlu1 %902, %v719_v40  }
 0x2b5   : > { %v728_v41 = vpop.permute.xlu0 %727 }
 0x2b6   : > { %v723_v42 = vpop.permute.xlu1 %722  ;;  %v742_v43 = vmul.f32 %v728_v41, %v607_v49  ;;  %v743_v45 = vmul.f32 %v728_v41, %v608_v50 }
 0x2b7   : > { %v740_v46 = vmul.f32 %v723_v42, %v605_v37  ;;  %v741_v47 = vmul.f32 %v723_v42, %v606_v38 }
 0x2b9   : > { %v748_v54 = vadd.f32 %v742_v43, %v740_v46  ;;  %v757_v56 = vadd.f32 %v743_v45, %v741_v47 }
 0x2ba   : > { %v733_v48 = vpop.permute.xlu1 %732 }
 0x2bb   : > { %v744_v52 = vmul.f32 %v733_v48, %v609_v61  ;;  %v745_v53 = vmul.f32 %v733_v48, %v610_v62 }
 0x2bd   : > { %v749_v49 = vadd.f32 %v748_v54, %v744_v52  ;;  %v758_v57 = vadd.f32 %v757_v56, %v745_v53 }
 0x2be   : > { %v738_v39 = vpop.permute.xlu1 %737 }
 0x2bf   : > { %v746_v44 = vmul.f32 %v738_v39, %v611_v3  ;;  %v747_v28 = vmul.f32 %v738_v39, %v612_v4 }
 0x2c1   : > { %v750_v33 = vadd.f32 %v749_v49, %v746_v44  ;;  %v759_v37 = vadd.f32 %v758_v57, %v747_v28 }
 0x2c3   : > { %v751_v38 = vrot.slane %v750_v33, 4  ;;  %v760_v50 = vrot.slane %v759_v37, 4 }
 0x2c5   : > { %v752_v51 = vadd.f32 %v751_v38, %v750_v33  ;;  %v761_v61 = vadd.f32 %v760_v50, %v759_v37 }
 0x2c7   : > { %v753_v55 = vrot.slane %v752_v51, 2  ;;  %v762_v62 = vrot.slane %v761_v61, 2 }
 0x2c9   : > { %v754_v58 = vadd.f32 %v753_v55, %v752_v51  ;;  %v763_v59 = vadd.f32 %v762_v62, %v761_v61 }
 0x2cb   : > { %v755_v60 = vrot.slane %v754_v58, 1  ;;  %v764_v0 = vrot.slane %v763_v59, 1 }
 0x2cd   : > { %v756_v63 = vadd.f32 %v755_v60, %v754_v58  ;;  %v765_v3 = vadd.f32 %v764_v0, %v763_v59 }
 0x2cf   : > { %v768_v8 = vadd.f32 %v767_v2, %v756_v63  ;;  %v769_v1 = vadd.f32 %v767_v2, %v765_v3 }
 0x2d1   : > { %v884_v4 = vmul.f32 -1.442695, %v768_v8  ;;  %v885_v9 = vmul.f32 -1.442695, %v769_v1 }
 0x2d3   : > { %919 = vpow2.f32 %v884_v4 }
 0x2d4   : > { %921 = vpow2.f32 %v885_v9 }
 0x2e0   : > { %v920_v10 = vpop.eup %919 }
 0x2e1   : > { %v922_v12 = vpop.eup %921  ;;  %v776_v13 = vadd.f32 1.0, %v920_v10 }
 0x2e2   : > { %v777_v14 = vadd.f32 1.0, %v922_v12 }
 0x2e3   : > { %923 = vrcp.f32 %v776_v13 }
 0x2e4   : > { %925 = vrcp.f32 %v777_v14 }
 0x2f0   : > { %v924_v15 = vpop.eup %923 }
 0x2f1   : > { %v926_v16 = vpop.eup %925  ;;  %v786_v17 = vmul.f32 %v924_v15, %v1025_v11  ;;  %v788_v18 = vmul.f32 %v924_v15, %v1019_v6 }
 0x2f2   : > { %v787_v19 = vmul.f32 %v926_v16, %v1021_v7  ;;  %v789_v20 = vmul.f32 %v926_v16, %v1013_v5 }
 0x2f3   : > { %790 = vst [vmem:[%s353_s30] sm:$0xff] %v786_v17  ;;  %792 = vst [vmem:[%s353_s30 + $0x10] sm:$0xff] %v788_v18 }
 0x2f4   : > { %791 = vst [vmem:[%s353_s30 + $0x8] sm:$0xff] %v787_v19  ;;  %793 = vst [vmem:[%s353_s30 + $0x18] sm:$0xff] %v789_v20 }
 0x2f5 PF: > { %s20_s11 = sadd.s32 1, %s933_s11  }
 0x2f6   : > { %p17_p4 = scmp.ge.s32.totalorder %s20_s11, 4  }
 0x2f8   :  { %19 = sbr.rel (!%p17_p4) target bundleno = 2 (0x2), region = 89 }

</bundles_post_ra>
